<compile_context>
chip_gen: v7x
topology: tpu7x:2x2x1
jax: 0.10.0
libtpu: 0.0.40
codegen_flags: <defaults>
</compile_context>

<pallas_src>
import jax
import jax.numpy as jnp
from jax import lax
from jax.experimental import pallas as pl
from jax.experimental.pallas import tpu as pltpu

# ----- model hyperparameters (synthetic "args") -----
EMBED_NUM = 50            # vocab size V
EMBED_DIM = 32            # D
CLASS_NUM = 5
KERNEL_NUM = 8            # out_channels C
KERNEL_SIZES = (3, 4, 5)
DROPOUT = 0.5             # identity in eval/inference mode

BATCH = 2
SEQ_LEN = 16

K_MAX = max(KERNEL_SIZES)
FEAT_DIM = KERNEL_NUM * len(KERNEL_SIZES)   # concat feature width (3*C = 24)
F1 = FEAT_DIM + 1                           # + constant-1 feature column (classifier bias)
KV1 = K_MAX * EMBED_NUM + 1                 # fused contraction depth (+1 conv-bias row)
PAD_OUT = 128                               # lane-dense padded class dimension


def cnn_text_kernel(tok_ref, w_ref, lw_ref, out_ref):
    """Fused forward in ONE conv matmul:
       shifted-one-hot tokens @ (embedding-folded conv weights + bias row)
       -> ReLU -> masked max-pool over sequence -> classifier into a lane-dense (B, 128) block.
    """
    BL = tok_ref.shape[0]                    # B * L
    B = out_ref.shape[0]
    L = BL // B
    V = EMBED_NUM

    # ---- LHS: K_MAX shifted one-hot blocks + trailing constant-1 bias column -------------
    # lhs[r, k*V + v] = (token at flat position r+k == v); lhs[r, K_MAX*V] = 1.
    # One broadcast compare + OR per shift; token values < V so blocks never collide.
    col = lax.broadcasted_iota(jnp.int32, (BL, KV1), 1)
    hit = col == (KV1 - 1)                                   # constant-1 bias column
    for k in range(K_MAX):
        hit = hit | (col == tok_ref[:, k:k + 1] + k * V)     # one-hot of token at offset k
    lhs = hit.astype(jnp.float32)                            # (BL, K_MAX*V + 1)

    # ---- single MXU matmul: embedding lookup + every conv branch + conv bias, then ReLU --
    # Column F1-1 of w_ref is zero except the bias row (=1), so conv[:, F1-1] == 1 everywhere;
    # it survives ReLU/max-pool as the constant-1 feature addressing the classifier bias row.
    conv = jnp.maximum(
        jnp.dot(lhs, w_ref[...], preferred_element_type=jnp.float32), 0.0)   # (BL, F1)

    # ---- validity mask: per branch i the valid conv length is L - K_i + 1 -----------------
    # Rows produced from wrapped / cross-batch token shifts only land in positions masked
    # out here; masking with 0.0 is neutral because ReLU guarantees conv >= 0.
    pos = lax.broadcasted_iota(jnp.int32, (L, F1), 0)
    ccol = lax.broadcasted_iota(jnp.int32, (L, F1), 1)
    thresh = jnp.full((L, F1), L - KERNEL_SIZES[0] + 1, jnp.int32)
    for i, K in enumerate(KERNEL_SIZES[1:], start=1):
        thresh = jnp.where(ccol >= i * KERNEL_NUM, L - K + 1, thresh)
    mask = pos < thresh                                      # (L, F1) bool

    # ---- max-pool over sequence positions, per batch (sublane-aligned static slices) ------
    pooled = []
    for b in range(B):
        blk = jnp.where(mask, conv[b * L:(b + 1) * L, :], 0.0)
        pooled.append(jnp.max(blk, axis=0, keepdims=True))   # (1, F1)
    feats = jnp.concatenate(pooled, axis=0)                  # (B, F1), last column == 1

    # ---- dropout is identity at eval; classifier (bias folded as last weight row) ---------
    out_ref[...] = jnp.dot(feats, lw_ref[...],
                           preferred_element_type=jnp.float32).astype(out_ref.dtype)


def pack_params(params):
    """Fold embedding, conv biases and classifier bias into two block weights."""
    V, D, C = EMBED_NUM, EMBED_DIM, KERNEL_NUM
    KV = K_MAX * V
    embed = params["embed"].astype(jnp.float32)

    # Fused conv weight (KV+1, F1): rows k*V+v of column group i hold embed[v] @ W_i[k];
    # rows with k >= K_i stay zero; row KV holds the conv bias; column FEAT_DIM is the
    # constant-1 feature (only its bias-row entry is 1).
    w_all = jnp.zeros((KV + 1, F1), jnp.float32)
    for i, K in enumerate(KERNEL_SIZES):
        ew = jnp.einsum("vd,kdc->kvc", embed, params[f"w{K}"],
                        precision=lax.Precision.HIGHEST).reshape(K * V, C)
        w_all = w_all.at[:K * V, i * C:(i + 1) * C].set(ew)
        w_all = w_all.at[KV, i * C:(i + 1) * C].set(params[f"b{K}"][0])
    w_all = w_all.at[KV, FEAT_DIM].set(1.0)

    # Classifier: bias folded as the last input row; output padded lane-dense to 128.
    lw_pad = jnp.zeros((F1, PAD_OUT), jnp.float32)
    lw_pad = lw_pad.at[:FEAT_DIM, :CLASS_NUM].set(params["lw"])
    lw_pad = lw_pad.at[FEAT_DIM, :CLASS_NUM].set(params["lb"][0])
    return {"w_all": w_all, "lw_pad": lw_pad}


@jax.jit
def cnn_text_forward(tokens, packed):
    B, L = tokens.shape
    assert L % 8 == 0, "SEQ_LEN must be a multiple of 8 (sublane-aligned max-pool slices)"
    BL = B * L
    flat = tokens.reshape(BL).astype(jnp.int32)
    # K_MAX shifted copies of the 1-lane token stream (cheap; wrapped rows only ever feed
    # conv positions that the in-kernel validity mask excludes from the max-pool).
    tok_shift = jnp.stack([jnp.roll(flat, -k) for k in range(K_MAX)], axis=1)   # (BL, K_MAX)

    inputs = (tok_shift, packed["w_all"], packed["lw_pad"])
    # Gridless, whole-array VMEM: total resident footprint is ~0.2 MB at these shapes.
    # TODO(synk): once BL >= 256, add a grid over the flattened BL axis (M-tile BlockSpec,
    # dimension_semantics=("parallel",)) and cast matmul operands to bf16 for v6e/v7x.
    out_pad = pl.pallas_call(
        cnn_text_kernel,
        out_shape=jax.ShapeDtypeStruct((B, PAD_OUT), jnp.float32),
        in_specs=[pl.BlockSpec(memory_space=pltpu.MemorySpace.VMEM)] * len(inputs),
        out_specs=pl.BlockSpec(memory_space=pltpu.MemorySpace.VMEM),
    )(*inputs)
    return out_pad[:, :CLASS_NUM]


def cnn_text_reference(tokens, params):
    """Pure-JAX reference mirroring the PyTorch forward (eval mode)."""
    emb = params["embed"][tokens]                        # (B, L, D)
    L = emb.shape[1]
    feats = []
    for K in KERNEL_SIZES:
        w, b = params[f"w{K}"], params[f"b{K}"]
        out_len = L - K + 1
        conv = jnp.zeros((emb.shape[0], out_len, KERNEL_NUM), jnp.float32)
        for k in range(K):
            conv = conv + jnp.einsum("bld,dc->blc", emb[:, k:k + out_len, :], w[k],
                                     precision=lax.Precision.HIGHEST)
        conv = jax.nn.relu(conv + b)                     # (B, out_len, C)
        feats.append(jnp.max(conv, axis=1))              # (B, C)
    x = jnp.concatenate(feats, axis=-1)                  # (B, 3C)
    # dropout is identity at inference
    return jnp.dot(x, params["lw"], precision=lax.Precision.HIGHEST) + params["lb"]


def make_params():
    keys = jax.random.split(jax.random.PRNGKey(0), 10)
    p = {
        "embed": 0.1 * jax.random.normal(keys[0], (EMBED_NUM, EMBED_DIM), jnp.float32),
        "w3": 0.1 * jax.random.normal(keys[1], (3, EMBED_DIM, KERNEL_NUM), jnp.float32),
        "b3": 0.1 * jax.random.normal(keys[2], (1, KERNEL_NUM), jnp.float32),
        "w4": 0.1 * jax.random.normal(keys[3], (4, EMBED_DIM, KERNEL_NUM), jnp.float32),
        "b4": 0.1 * jax.random.normal(keys[4], (1, KERNEL_NUM), jnp.float32),
        "w5": 0.1 * jax.random.normal(keys[5], (5, EMBED_DIM, KERNEL_NUM), jnp.float32),
        "b5": 0.1 * jax.random.normal(keys[6], (1, KERNEL_NUM), jnp.float32),
        "lw": 0.1 * jax.random.normal(keys[7],
                                      (KERNEL_NUM * len(KERNEL_SIZES), CLASS_NUM),
                                      jnp.float32),
        "lb": 0.1 * jax.random.normal(keys[8], (1, CLASS_NUM), jnp.float32),
    }
    tokens = jax.random.randint(keys[9], (BATCH, SEQ_LEN), 0, EMBED_NUM, dtype=jnp.int32)
    return p, tokens


if __name__ == "__main__":
    params, tokens = make_params()
    packed = pack_params(params)

    out = cnn_text_forward(tokens, packed)
    out = jax.block_until_ready(out)

    ref = cnn_text_reference(tokens, params)
    assert out.shape == (BATCH, CLASS_NUM)
    assert jnp.allclose(out, ref, rtol=1e-4, atol=1e-5), (out, ref)

    print("KERNEL_OK")
</pallas_src>

<mosaic_0001>
module attributes {stable_mosaic.version = 11 : i64} {
  func.func @cnn_text_kernel(%arg0: memref<32x5xi32, #tpu.memory_space<vmem>>, %arg1: memref<251x25xf32, #tpu.memory_space<vmem>>, %arg2: memref<25x128xf32, #tpu.memory_space<vmem>>, %arg3: memref<2x128xf32, #tpu.memory_space<vmem>>) attributes {dimension_semantics = [], scalar_prefetch = 0 : i64, scratch_operands = 0 : i64, tpu.core_type = #tpu.core_type<tc>} {
    %0 = tpu.iota {dimensions = array<i32: 1>} : vector<32x251xi32>
    %c250_i32 = arith.constant 250 : i32
    %1 = vector.broadcast %c250_i32 : i32 to vector<32x251xi32>
    %2 = arith.cmpi eq, %0, %1 : vector<32x251xi32>
    %c0 = arith.constant 0 : index
    %c0_0 = arith.constant 0 : index
    %3 = vector.load %arg0[%c0, %c0_0] : memref<32x5xi32, #tpu.memory_space<vmem>>, vector<32x1xi32>
    %c0_i32 = arith.constant 0 : i32
    %4 = vector.broadcast %c0_i32 : i32 to vector<32x1xi32>
    %5 = arith.addi %3, %4 : vector<32x1xi32>
    %6 = vector.broadcast %5 : vector<32x1xi32> to vector<32x251xi32>
    %7 = arith.cmpi eq, %0, %6 : vector<32x251xi32>
    %8 = arith.ori %2, %7 : vector<32x251xi1>
    %c0_1 = arith.constant 0 : index
    %c1 = arith.constant 1 : index
    %9 = vector.load %arg0[%c0_1, %c1] : memref<32x5xi32, #tpu.memory_space<vmem>>, vector<32x1xi32>
    %c50_i32 = arith.constant 50 : i32
    %10 = vector.broadcast %c50_i32 : i32 to vector<32x1xi32>
    %11 = arith.addi %9, %10 : vector<32x1xi32>
    %12 = vector.broadcast %11 : vector<32x1xi32> to vector<32x251xi32>
    %13 = arith.cmpi eq, %0, %12 : vector<32x251xi32>
    %14 = arith.ori %8, %13 : vector<32x251xi1>
    %c0_2 = arith.constant 0 : index
    %c2 = arith.constant 2 : index
    %15 = vector.load %arg0[%c0_2, %c2] : memref<32x5xi32, #tpu.memory_space<vmem>>, vector<32x1xi32>
    %c100_i32 = arith.constant 100 : i32
    %16 = vector.broadcast %c100_i32 : i32 to vector<32x1xi32>
    %17 = arith.addi %15, %16 : vector<32x1xi32>
    %18 = vector.broadcast %17 : vector<32x1xi32> to vector<32x251xi32>
    %19 = arith.cmpi eq, %0, %18 : vector<32x251xi32>
    %20 = arith.ori %14, %19 : vector<32x251xi1>
    %c0_3 = arith.constant 0 : index
    %c3 = arith.constant 3 : index
    %21 = vector.load %arg0[%c0_3, %c3] : memref<32x5xi32, #tpu.memory_space<vmem>>, vector<32x1xi32>
    %c150_i32 = arith.constant 150 : i32
    %22 = vector.broadcast %c150_i32 : i32 to vector<32x1xi32>
    %23 = arith.addi %21, %22 : vector<32x1xi32>
    %24 = vector.broadcast %23 : vector<32x1xi32> to vector<32x251xi32>
    %25 = arith.cmpi eq, %0, %24 : vector<32x251xi32>
    %26 = arith.ori %20, %25 : vector<32x251xi1>
    %c0_4 = arith.constant 0 : index
    %c4 = arith.constant 4 : index
    %27 = vector.load %arg0[%c0_4, %c4] : memref<32x5xi32, #tpu.memory_space<vmem>>, vector<32x1xi32>
    %c200_i32 = arith.constant 200 : i32
    %28 = vector.broadcast %c200_i32 : i32 to vector<32x1xi32>
    %29 = arith.addi %27, %28 : vector<32x1xi32>
    %30 = vector.broadcast %29 : vector<32x1xi32> to vector<32x251xi32>
    %31 = arith.cmpi eq, %0, %30 : vector<32x251xi32>
    %32 = arith.ori %26, %31 : vector<32x251xi1>
    %33 = arith.extui %32 : vector<32x251xi1> to vector<32x251xi32>
    %34 = arith.sitofp %33 : vector<32x251xi32> to vector<32x251xf32>
    %c0_5 = arith.constant 0 : index
    %c0_6 = arith.constant 0 : index
    %35 = vector.load %arg1[%c0_5, %c0_6] : memref<251x25xf32, #tpu.memory_space<vmem>>, vector<251x25xf32>
    %cst = arith.constant dense<0.000000e+00> : vector<32x25xf32>
    %36 = tpu.matmul %34, %35, %cst {dimension_numbers = #tpu.dot_dimension_numbers<[1], [0], [0], [1], [0, 0, 1, 1], [], []>} : vector<32x251xf32>, vector<251x25xf32>, vector<32x25xf32> -> vector<32x25xf32>
    %cst_7 = arith.constant 0.000000e+00 : f32
    %37 = vector.broadcast %cst_7 : f32 to vector<32x25xf32>
    %38 = arith.maximumf %36, %37 : vector<32x25xf32>
    %39 = tpu.iota {dimensions = array<i32: 0>} : vector<16x25xi32>
    %40 = tpu.iota {dimensions = array<i32: 1>} : vector<16x25xi32>
    %c14_i32 = arith.constant 14 : i32
    %41 = vector.broadcast %c14_i32 : i32 to vector<16x25xi32>
    %c8_i32 = arith.constant 8 : i32
    %42 = vector.broadcast %c8_i32 : i32 to vector<16x25xi32>
    %43 = arith.cmpi sge, %40, %42 : vector<16x25xi32>
    %c13_i32 = arith.constant 13 : i32
    %44 = vector.broadcast %c13_i32 : i32 to vector<16x25xi32>
    %45 = arith.select %43, %44, %41 : vector<16x25xi1>, vector<16x25xi32>
    %c16_i32 = arith.constant 16 : i32
    %46 = vector.broadcast %c16_i32 : i32 to vector<16x25xi32>
    %47 = arith.cmpi sge, %40, %46 : vector<16x25xi32>
    %c12_i32 = arith.constant 12 : i32
    %48 = vector.broadcast %c12_i32 : i32 to vector<16x25xi32>
    %49 = arith.select %47, %48, %45 : vector<16x25xi1>, vector<16x25xi32>
    %50 = arith.cmpi slt, %39, %49 : vector<16x25xi32>
    %51 = vector.extract_strided_slice %38 {offsets = [0, 0], sizes = [16, 25], strides = [1, 1]} : vector<32x25xf32> to vector<16x25xf32>
    %cst_8 = arith.constant 0.000000e+00 : f32
    %52 = vector.broadcast %cst_8 : f32 to vector<16x25xf32>
    %53 = arith.select %50, %51, %52 : vector<16x25xi1>, vector<16x25xf32>
    %cst_9 = arith.constant dense<0xFF800000> : vector<25xf32>
    %54 = vector.multi_reduction <maximumf>, %53, %cst_9 [0] : vector<16x25xf32> to vector<25xf32>
    %55 = vector.shape_cast %54 : vector<25xf32> to vector<1x25xf32>
    %56 = vector.extract_strided_slice %38 {offsets = [16, 0], sizes = [16, 25], strides = [1, 1]} : vector<32x25xf32> to vector<16x25xf32>
    %cst_10 = arith.constant 0.000000e+00 : f32
    %57 = vector.broadcast %cst_10 : f32 to vector<16x25xf32>
    %58 = arith.select %50, %56, %57 : vector<16x25xi1>, vector<16x25xf32>
    %cst_11 = arith.constant dense<0xFF800000> : vector<25xf32>
    %59 = vector.multi_reduction <maximumf>, %58, %cst_11 [0] : vector<16x25xf32> to vector<25xf32>
    %60 = vector.shape_cast %59 : vector<25xf32> to vector<1x25xf32>
    %61 = tpu.concatenate %55, %60 in 0 : vector<1x25xf32>, vector<1x25xf32> -> vector<2x25xf32>
    %c0_12 = arith.constant 0 : index
    %c0_13 = arith.constant 0 : index
    %62 = vector.load %arg2[%c0_12, %c0_13] : memref<25x128xf32, #tpu.memory_space<vmem>>, vector<25x128xf32>
    %cst_14 = arith.constant dense<0.000000e+00> : vector<2x128xf32>
    %63 = tpu.matmul %61, %62, %cst_14 {dimension_numbers = #tpu.dot_dimension_numbers<[1], [0], [0], [1], [0, 0, 1, 1], [], []>} : vector<2x25xf32>, vector<25x128xf32>, vector<2x128xf32> -> vector<2x128xf32>
    %c0_15 = arith.constant 0 : index
    %c0_16 = arith.constant 0 : index
    %64 = vector.load %arg3[%c0_15, %c0_16] : memref<2x128xf32, #tpu.memory_space<vmem>>, vector<2x128xf32>
    tpu.vector_store %arg3[%c0_15, %c0_16], %63 {strides = array<i32>} : memref<2x128xf32, #tpu.memory_space<vmem>>, vector<2x128xf32>,
    return
  }
}

</mosaic_0001>

<bundles_post_ra>
// kernel: cnn_text_forward.1
= control target key start
LH: loop header
LB: loop body
LE: loop exit
PB: predicated region body
PF: predicated region fallthrough
CT: control target
= control target key end

     0   :  { %v633_v1 = vmov 0   ;;  %v634_v2 = vmov 2   ;;  %v635_v15 = vmov 4   ;;  %v636_v19 = vmov 3   ;;  %s918_s0 = inlined_call_operand.vmem [shape: s32[32,5], index: 0, kind: input, shape index: {}]   ;;  %s919_s1 = inlined_call_operand.vmem [shape: f32[251,25], index: 1, kind: input, shape index: {}]   ;;  %s920_s2 = inlined_call_operand.vmem [shape: f32[25,128], index: 2, kind: input, shape index: {}]   ;;  %s921_s3 = inlined_call_operand.hbm [shape: f32[2,128], index: 3, kind: output, shape index: {}]  }
   0x1   :  { %v20_v0 = vld [vmem:[%s918_s0] sm:$0xff]  ;;  %589 = vset.pattern.permute.xlu0 %v633_v1  ;;  %590 = vset.pattern.permute.xlu1 %v634_v2  ;;  %v213_v5 = vld [vmem:[%s919_s1 + $0x88] sm:$0xff]  ;;  %v214_v10 = vld [vmem:[%s919_s1 + $0x90] sm:$0xff] }
   0x2   :  { %v84_v3 = vadd.s32 100, %v20_v0  ;;  %25 = vperm.xlu0 %589, %v20_v0   ;;  %v212_v4 = vld [vmem:[%s919_s1 + $0x80] sm:$0xff]  ;;  %v148_v6 = vadd.s32 200, %v20_v0  ;;  %v197_v8 = vld [vmem:[%s919_s1 + $0x8] sm:$0xff]  ;;  %v116_v9 = vadd.s32 150, %v20_v0  ;;  %v215_v11 = vld [vmem:[%s919_s1 + $0x98] sm:$0xff] }
   0x3   :  { %v196_v7 = vld [vmem:[%s919_s1] sm:$0xff]  ;;  %v690_v12 = vld [vmem:[%s918_s0 + $0x8] sm:$0xff]  ;;  %v538_v13 = vpack.c.bf16 %v213_v5, %v212_v4  ;;  %v542_v16 = vpack.c.bf16 %v215_v11, %v214_v10  ;;  %v198_v17 = vld [vmem:[%s919_s1 + $0x10] sm:$0xff] }
   0x4   :  { %89 = vperm.xlu1 %590, %v84_v3   ;;  %v540_v14 = vpack.c.bf16 %v197_v8, %v196_v7  ;;  %v199_v18 = vld [vmem:[%s919_s1 + $0x18] sm:$0xff]  ;;  %v216_v20 = vld [vmem:[%s919_s1 + $0xa0] sm:$0xff]  ;;  %v217_v21 = vld [vmem:[%s919_s1 + $0xa8] sm:$0xff]  ;;  %v117_v22 = vadd.s32 150, %v690_v12 }
   0x5   :  { %539 = vmatprep.subr.bf16.mxu0 %v538_v13  ;;  %v544_v23 = vpack.c.bf16 %v199_v18, %v198_v17  ;;  %v546_v24 = vpack.c.bf16 %v217_v21, %v216_v20  ;;  %v200_v25 = vld [vmem:[%s919_s1 + $0x20] sm:$0xff]  ;;  %v201_v26 = vld [vmem:[%s919_s1 + $0x28] sm:$0xff] }
   0x6   :  { %593 = vset.pattern.permute.xlu0 %v635_v15  ;;  %541 = vmatpush3.bf16.msra.mxu0 %v540_v14 }
   0x7   :  { %153 = vperm.xlu0 %593, %v148_v6   ;;  %543 = vmatprep.subr.bf16.mxu0 %v542_v16 }
   0x8   :  { %591 = vset.pattern.permute.xlu1 %v636_v19 }
   0x9   :  { %121 = vperm.xlu1 %591, %v116_v9  }
   0xb   :  { %596 = vset.pattern.permute.xlu0 %v636_v19 }
   0xc   :  { %8 = vsyncpa [#allocation3], 0  ;;  %124 = vperm.xlu0 %596, %v117_v22   ;;  %v218_v27 = vld [vmem:[%s919_s1 + $0xb0] sm:$0xff]  ;;  %v219_v28 = vld [vmem:[%s919_s1 + $0xb8] sm:$0xff]  ;;  %v52_v29 = vadd.s32 50, %v20_v0  ;;  %545 = vmatpush3.bf16.msra.mxu0 %v544_v23  ;;  %v53_v30 = vadd.s32 50, %v690_v12  ;;  %v548_v32 = vpack.c.bf16 %v201_v26, %v200_v25  ;;  %v15_v11 = vlaneseq }
   0xd   :  { %592 = vset.pattern.permute.xlu1 %v633_v1  ;;  %v726_v31 = vld [vmem:[%s918_s0 + $0x10] sm:$0xff]  ;;  %547 = vmatprep.subr.bf16.mxu0 %v546_v24  ;;  %v550_v33 = vpack.c.bf16 %v219_v28, %v218_v27  ;;  %v203_v35 = vld [vmem:[%s919_s1 + $0x38] sm:$0xff]  ;;  %v637_v36 = vmov 1   ;;  %v220_v37 = vld [vmem:[%s919_s1 + $0xc0] sm:$0xff]  ;;  %v85_v41 = vadd.s32 100, %v690_v12  ;;  %v149_v61 = vadd.s32 200, %v690_v12 }
   0xe   :  { %28 = vperm.xlu1 %592, %v690_v12   ;;  %v202_v34 = vld [vmem:[%s919_s1 + $0x30] sm:$0xff]  ;;  %v221_v38 = vld [vmem:[%s919_s1 + $0xc8] sm:$0xff]  ;;  %v54_v39 = vadd.s32 50, %v726_v31  ;;  %v204_v43 = vld [vmem:[%s919_s1 + $0x40] sm:$0xff]  ;;  %vm241_vm0 = vcmask 1042432   ;;  %vm922_vm1 = vmmov 1  }
   0xf   :  { %v552_v40 = vpack.c.bf16 %v203_v35, %v202_v34  ;;  %v554_v42 = vpack.c.bf16 %v221_v38, %v220_v37  ;;  %v205_v44 = vld [vmem:[%s919_s1 + $0x48] sm:$0xff]  ;;  %v222_v45 = vld [vmem:[%s919_s1 + $0xd0] sm:$0xff]  ;;  %v223_v46 = vld [vmem:[%s919_s1 + $0xd8] sm:$0xff]  ;;  %v86_v3 = vadd.s32 100, %v726_v31  ;;  %v118_v5 = vadd.s32 150, %v726_v31 }
  0x10   :  { %597 = vset.pattern.permute.xlu0 %v637_v36  ;;  %549 = vmatpush3.bf16.msra.mxu0 %v548_v32  ;;  %v556_v47 = vpack.c.bf16 %v205_v44, %v204_v43  ;;  %v23_v48 = vld [vmem:[%s918_s0 + $0x18] sm:$0xff]  ;;  %v558_v49 = vpack.c.bf16 %v223_v46, %v222_v45  ;;  %v206_v50 = vld [vmem:[%s919_s1 + $0x50] sm:$0xff]  ;;  %v224_v52 = vld [vmem:[%s919_s1 + $0xe0] sm:$0xff]  ;;  %v150_v6 = vadd.s32 200, %v726_v31  ;;  %v808_v14 = vand.u32 127, %v15_v11 }
  0x11   :  { %57 = vperm.xlu0 %597, %v52_v29   ;;  %551 = vmatprep.subr.bf16.mxu0 %v550_v33  ;;  %v207_v51 = vld [vmem:[%s919_s1 + $0x58] sm:$0xff]  ;;  %v225_v53 = vld [vmem:[%s919_s1 + $0xe8] sm:$0xff]  ;;  %v87_v55 = vadd.s32 100, %v23_v48  ;;  %v208_v57 = vld [vmem:[%s919_s1 + $0x60] sm:$0xff]  ;;  %v55_v7 = vadd.s32 50, %v23_v48  ;;  %v119_v8 = vadd.s32 150, %v23_v48 }
  0x12   :  { %594 = vset.pattern.permute.xlu1 %v637_v36  ;;  %v560_v54 = vpack.c.bf16 %v207_v51, %v206_v50  ;;  %v562_v56 = vpack.c.bf16 %v225_v53, %v224_v52  ;;  %v209_v58 = vld [vmem:[%s919_s1 + $0x68] sm:$0xff]  ;;  %v226_v59 = vld [vmem:[%s919_s1 + $0xf0] sm:$0xff]  ;;  %v227_v60 = vld [vmem:[%s919_s1 + $0xf8] sm:$0x7]  ;;  %v811_v17 = vadd.s32 128, %v808_v14  ;;  %v639_v23 = vmov 0.0  }
  0x13   :  { %60 = vperm.xlu1 %594, %v53_v30   ;;  %v564_v62 = vpack.c.bf16 %v209_v58, %v208_v57  ;;  %v566_v63 = vpack.c.bf16 %v227_v60, %v226_v59  ;;  %v210_v0 = vld [vmem:[%s919_s1 + $0x70] sm:$0xff]  ;;  %vm567_vm2 = vmpackc.low %vm241_vm0, %vm922_vm1  ;;  %v369_v43 = vld [vmem:[%s920_s2 + $0x8] sm:$0xff]  ;;  %v640_v45 = vmov 0.0|0.0   ;;  %v335_v52 = vshrl.u32 %v15_v11, 7 }
  0x14   :  { %553 = vmatpush3.bf16.msra.mxu0 %v552_v40  ;;  %vm923_vm4 = vcmp.eq.s32.totalorder %v811_v17, 250  ;;  %v370_v44 = vld [vmem:[%s920_s2 + $0x10] sm:$0xff]  ;;  %571 = vmatprep.subr.bf16.mxu1 %v640_v45  ;;  %v642_v53 = vmov 14  }
  0x15   :  { %63 = vperm.xlu0 %597, %v54_v39   ;;  %555 = vmatprep.subr.bf16.mxu0 %v554_v42  ;;  %v368_v42 = vld [vmem:[%s920_s2] sm:$0xff] }
  0x16   :  { %v572_v46 = vpack.c.bf16 %v369_v43, %v368_v42 }
  0x17   :  { %595 = vset.pattern.permute.xlu1 %v634_v2 }
  0x18   :  { %92 = vperm.xlu1 %595, %v85_v41   ;;  %557 = vmatpush3.bf16.msra.mxu0 %v556_v47  ;;  %v371_v47 = vld [vmem:[%s920_s2 + $0x18] sm:$0x1]  ;;  %s643_s2 = smov [#allocation2]  }
  0x19   :  { %602 = vset.pattern.permute.xlu0 %v633_v1  ;;  %559 = vmatprep.subr.bf16.mxu0 %v558_v49  ;;  %s455_s9 = sshll.u32 %s643_s2, 4  ;;  %s456_s9 = int_to_ptr.vmem [resolvable:$true] %s455_s9 }
  0x1a   :  { %34 = vperm.xlu0 %602, %v23_v48   ;;  %573 = vmatpush3.bf16.msra.mxu1 %v572_v46  ;;  %s609_s10 = scalar_lea.vmem %s456_s9, 32  ;;  %p614_p1 = scmp.lt.s32.totalorder %s456_s9, %s456_s9 }
  0x1b   :  { %574 = vmatprep.subr.bf16.mxu1 %v640_v45  ;;  %p610_p0 = scmp.ne.s32.totalorder %s456_s9, %s609_s10  ;;  %p615_p2 = scmp.lt.s32.totalorder %s609_s10, %s609_s10 }
  0x1c   :  { %598 = vset.pattern.permute.xlu1 %v633_v1  ;;  %561 = vmatpush3.bf16.msra.mxu0 %v560_v54  ;;  %v211_v1 = vld [vmem:[%s919_s1 + $0x78] sm:$0xff] }
  0x1d   :  { %31 = vperm.xlu1 %598, %v726_v31   ;;  %563 = vmatprep.subr.bf16.mxu0 %v562_v56  ;;  %v569_v4 = vpack.c.bf16 %v211_v1, %v210_v0  ;;  %p616_p3 = por %p615_p2, %p614_p1 }
  0x1e   :  { %605 = vset.pattern.permute.xlu0 %v634_v2 }
  0x1f   :  { %98 = vperm.xlu0 %605, %v87_v55   ;;  %v336_v55 = vadd.s32 8, %v335_v52  ;;  %p617_p4 = pnand %p616_p3, %p610_p0 }
  0x20   :  { %565 = vmatpush3.bf16.msra.mxu0 %v564_v62 }
  0x21   :  { %599 = vset.pattern.permute.xlu1 %v635_v15  ;;  %568 = vmatprep.subr.msk.bf16.mxu0 %vm567_vm2, %v566_v63 }
  0x22   :  { %156 = vperm.xlu1 %599, %v149_v61  }
  0x23   :  { %608 = vset.pattern.permute.xlu0 %v635_v15 }
  0x24   :  { %570 = vmatpush3.bf16.msra.mxu0 %v569_v4 }
  0x26   :  { %600 = vset.pattern.permute.xlu1 %v634_v2  ;;  %v151_v2 = vadd.s32 200, %v23_v48  ;;  %v575_v48 = vpack.c.bf16 %v371_v47, %v370_v44 }
  0x27   :  { %95 = vperm.xlu1 %600, %v86_v3  }
  0x2b   :  { %601 = vset.pattern.permute.xlu1 %v636_v19 }
  0x2c   :  { %127 = vperm.xlu1 %601, %v118_v5  }
  0x30   :  { %603 = vset.pattern.permute.xlu1 %v635_v15 }
  0x31   :  { %159 = vperm.xlu1 %603, %v150_v6  }
  0x35   :  { %604 = vset.pattern.permute.xlu1 %v637_v36 }
  0x36   :  { %66 = vperm.xlu1 %604, %v55_v7  }
  0x3a   :  { %606 = vset.pattern.permute.xlu1 %v636_v19 }
  0x3b   :  { %130 = vperm.xlu1 %606, %v119_v8  }
  0x3f   :  { %607 = vset.pattern.permute.xlu1 %v635_v15 }
  0x40   :  { %162 = vperm.xlu1 %607, %v151_v2  }
  0x81   :  { %v26_v9 = vpop.permute.xlu0 %25 }
  0x82   :  { %vm37_vm3 = vcmp.eq.s32.totalorder %v811_v17, %v26_v9  ;;  %vm36_vm7 = vcmp.eq.s32.totalorder %v808_v14, %v26_v9 }
  0x83   :  { %v90_v10 = vpop.permute.xlu1 %89  ;;  %vm45_vm5 = vmor %vm923_vm4, %vm37_vm3 }
  0x84   :  { %vm101_vm12 = vcmp.eq.s32.totalorder %v811_v17, %v90_v10  ;;  %vm100_vm15 = vcmp.eq.s32.totalorder %v808_v14, %v90_v10 }
  0x86   :  { %v154_v12 = vpop.permute.xlu0 %153 }
  0x87   :  { %vm165_vm2 = vcmp.eq.s32.totalorder %v811_v17, %v154_v12 }
  0x88   :  { %v122_v13 = vpop.permute.xlu1 %121 }
  0x89   :  { %vm133_vm1 = vcmp.eq.s32.totalorder %v811_v17, %v122_v13 }
  0x8b   :  { %v125_v16 = vpop.permute.xlu0 %124 }
  0x8d   :  { %v29_v18 = vpop.permute.xlu1 %28 }
  0x8e   :  { %vm39_vm9 = vcmp.eq.s32.totalorder %v811_v17, %v29_v18 }
  0x8f   :  { %vm47_vm13 = vmor %vm923_vm4, %vm39_vm9  ;;  %vm132_vm9 = vcmp.eq.s32.totalorder %v808_v14, %v122_v13 }
  0x90   :  { %v58_v19 = vpop.permute.xlu0 %57 }
  0x91   :  { %vm69_vm6 = vcmp.eq.s32.totalorder %v811_v17, %v58_v19  ;;  %vm68_vm8 = vcmp.eq.s32.totalorder %v808_v14, %v58_v19 }
  0x92   :  { %v61_v15 = vpop.permute.xlu1 %60  ;;  %vm77_vm10 = vmor %vm45_vm5, %vm69_vm6  ;;  %vm164_vm6 = vcmp.eq.s32.totalorder %v808_v14, %v154_v12 }
  0x93   :  { %vm76_vm11 = vmor %vm36_vm7, %vm68_vm8  ;;  %vm71_vm14 = vcmp.eq.s32.totalorder %v811_v17, %v61_v15  ;;  %vm924_vm8 = vcmask 1006592  }
  0x94   :  { %vm109_vm0 = vmor %vm77_vm10, %vm101_vm12  ;;  %vm70_vm12 = vcmp.eq.s32.totalorder %v808_v14, %v61_v15  ;;  %v64_v28 = vpop.permute.xlu0 %63 }
  0x95   :  { %vm108_vm3 = vmor %vm76_vm11, %vm100_vm15  ;;  %vm38_vm15 = vcmp.eq.s32.totalorder %v808_v14, %v29_v18 }
  0x96   :  { %vm828_vm5 = vmor %vm47_vm13, %vm71_vm14 }
  0x97   :  { %v93_v20 = vpop.permute.xlu1 %92  ;;  %vm141_vm7 = vmor %vm109_vm0, %vm133_vm1  ;;  %vm135_vm1 = vcmp.eq.s32.totalorder %v811_v17, %v125_v16 }
  0x98   :  { %vm103_vm4 = vcmp.eq.s32.totalorder %v811_v17, %v93_v20  ;;  %vm173_vm10 = vmor %vm141_vm7, %vm165_vm2  ;;  %vm102_vm13 = vcmp.eq.s32.totalorder %v808_v14, %v93_v20  ;;  %vm134_vm7 = vcmp.eq.s32.totalorder %v808_v14, %v125_v16 }
  0x99   :  { %v464_v24 = vsel %vm173_vm10, 1.0, %v639_v23  ;;  %vm140_vm11 = vmor %vm108_vm3, %vm132_vm9  ;;  %v35_v33 = vpop.permute.xlu0 %34 }
  0x9a   :  { %472 = vmatprep.mubr.msk.f32.mxu0 %vm924_vm8, %v464_v24  ;;  %vm172_vm14 = vmor %vm140_vm11, %vm164_vm6 }
  0x9b   :  { %vm111_vm0 = vmor %vm828_vm5, %vm103_vm4  ;;  %v463_v25 = vsel %vm172_vm14, 1.0, %v639_v23  ;;  %vm927_vm4 = vcmask 1006592   ;;  %vm72_vm14 = vcmp.eq.s32.totalorder %v808_v14, %v64_v28 }
  0x9c   :  { %v32_v22 = vpop.permute.xlu1 %31  ;;  %vm78_vm2 = vmor %vm38_vm15, %vm70_vm12  ;;  %310 = vmatmul.mubr.f32.vlgmr.msra.gmra.mrb[0].mxu0 %v463_v25 }
  0x9d   :  { %vm110_vm10 = vmor %vm78_vm2, %vm102_vm13  ;;  %vm41_vm12 = vcmp.eq.s32.totalorder %v811_v17, %v32_v22  ;;  %vm40_vm13 = vcmp.eq.s32.totalorder %v808_v14, %v32_v22 }
  0x9e   :  { %vm143_vm3 = vmor %vm111_vm0, %vm135_vm1  ;;  %vm928_vm1 = vcmp.eq.s32.totalorder %v811_v17, 250  ;;  %vm73_vm0 = vcmp.eq.s32.totalorder %v811_v17, %v64_v28  ;;  %v99_v37 = vpop.permute.xlu0 %98 }
  0x9f   :  { %vm142_vm8 = vmor %vm110_vm10, %vm134_vm7 }
  0xa0   :  { %vm49_vm15 = vmor %vm928_vm1, %vm41_vm12 }
  0xa1   :  { %v157_v26 = vpop.permute.xlu1 %156  ;;  %vm81_vm10 = vmor %vm49_vm15, %vm73_vm0  ;;  %vm929_vm0 = vcmask 1006592   ;;  %vm43_vm15 = vcmp.eq.s32.totalorder %v811_v17, %v35_v33 }
  0xa2   :  { %vm166_vm9 = vcmp.eq.s32.totalorder %v808_v14, %v157_v26  ;;  %vm167_vm6 = vcmp.eq.s32.totalorder %v811_v17, %v157_v26 }
  0xa3   :  { %vm175_vm11 = vmor %vm143_vm3, %vm167_vm6 }
  0xa4   :  { %v466_v27 = vsel %vm175_vm11, 1.0, %v639_v23  ;;  %vm174_vm5 = vmor %vm142_vm8, %vm166_vm9 }
  0xa5   :  { %473 = vmatprep.mubr.msk.f32.mxu0 %vm927_vm4, %v466_v27  ;;  %v465_v30 = vsel %vm174_vm5, 1.0, %v639_v23  ;;  %vm80_vm8 = vmor %vm40_vm13, %vm72_vm14 }
  0xa6   :  { %v96_v29 = vpop.permute.xlu1 %95  ;;  %315 = vmatmul.mubr.f32.gmra.mrb[2].mxu0 %v465_v30 }
  0xa7   :  { %vm104_vm2 = vcmp.eq.s32.totalorder %v808_v14, %v96_v29  ;;  %vm105_vm7 = vcmp.eq.s32.totalorder %v811_v17, %v96_v29 }
  0xa8   :  { %vm112_vm9 = vmor %vm80_vm8, %vm104_vm2  ;;  %vm42_vm2 = vcmp.eq.s32.totalorder %v808_v14, %v35_v33 }
  0xa9   :  { %vm113_vm11 = vmor %vm81_vm10, %vm105_vm7  ;;  %vm930_vm7 = vcmp.eq.s32.totalorder %v811_v17, 250 }
  0xaa   :  { %vm51_vm10 = vmor %vm930_vm7, %vm43_vm15 }
  0xab   :  { %v128_v31 = vpop.permute.xlu1 %127 }
  0xac   :  { %vm136_vm3 = vcmp.eq.s32.totalorder %v808_v14, %v128_v31  ;;  %vm137_vm6 = vcmp.eq.s32.totalorder %v811_v17, %v128_v31 }
  0xad   :  { %vm144_vm4 = vmor %vm112_vm9, %vm136_vm3 }
  0xae   :  { %vm145_vm5 = vmor %vm113_vm11, %vm137_vm6  ;;  %vm106_vm6 = vcmp.eq.s32.totalorder %v808_v14, %v99_v37 }
  0xb0   :  { %v160_v32 = vpop.permute.xlu1 %159 }
  0xb1   :  { %vm168_vm12 = vcmp.eq.s32.totalorder %v808_v14, %v160_v32  ;;  %vm169_vm1 = vcmp.eq.s32.totalorder %v811_v17, %v160_v32 }
  0xb2   :  { %vm177_vm13 = vmor %vm145_vm5, %vm169_vm1 }
  0xb3   :  { %v468_v34 = vsel %vm177_vm13, 1.0, %v639_v23  ;;  %vm176_vm14 = vmor %vm144_vm4, %vm168_vm12  ;;  %vm107_vm4 = vcmp.eq.s32.totalorder %v811_v17, %v99_v37 }
  0xb4   :  { %474 = vmatprep.mubr.msk.f32.mxu0 %vm929_vm0, %v468_v34  ;;  %v467_v35 = vsel %vm176_vm14, 1.0, %v639_v23 }
  0xb5   :  { %v67_v36 = vpop.permute.xlu1 %66  ;;  %320 = vmatmul.mubr.f32.gmra.mrb[4].mxu0 %v467_v35 }
  0xb6   :  { %vm74_vm8 = vcmp.eq.s32.totalorder %v808_v14, %v67_v36  ;;  %vm75_vm3 = vcmp.eq.s32.totalorder %v811_v17, %v67_v36 }
  0xb7   :  { %vm82_vm9 = vmor %vm42_vm2, %vm74_vm8 }
  0xb8   :  { %vm83_vm11 = vmor %vm51_vm10, %vm75_vm3  ;;  %vm931_vm10 = vcmask 1006592   ;;  %vm366_vm3 = vcmask 1040384  }
  0xb9   :  { %vm114_vm12 = vmor %vm82_vm9, %vm106_vm6  ;;  %vm641_vm9 = vmmov 0   ;;  %vm932_vm6 = vmmov 1  }
  0xba   :  { %v131_v38 = vpop.permute.xlu1 %130  ;;  %vm115_vm13 = vmor %vm83_vm11, %vm107_vm4  ;;  %535 = vmatprep.mubr.msk.f32.mxu1 %vm641_vm9, %v639_v23  ;;  %vm337_vm4 = vcmp.ge.s32.totalorder %v808_v14, 8 }
  0xbb   :  { %vm138_vm5 = vcmp.eq.s32.totalorder %v808_v14, %v131_v38  ;;  %vm139_vm1 = vcmp.eq.s32.totalorder %v811_v17, %v131_v38  ;;  %vm576_vm11 = vmpackc.low %vm366_vm3, %vm932_vm6  ;;  %v338_v54 = vsel %vm337_vm4, 13, %v642_v53 }
  0xbc   :  { %vm146_vm14 = vmor %vm114_vm12, %vm138_vm5  ;;  %577 = vmatpush3.bf16.msk.msra.mxu1 %vm576_vm11, %v575_v48  ;;  %vm339_vm5 = vcmp.ge.s32.totalorder %v808_v14, 16 }
  0xbd   :  { %vm147_vm0 = vmor %vm115_vm13, %vm139_vm1  ;;  %v340_v57 = vsel %vm339_vm5, 12, %v338_v54  ;;  %vm345_vm1 = vcmask 203776  }
  0xbe   :  { %vm342_vm12 = vcmp.lt.s32.totalorder %v336_v55, %v340_v57 }
  0xbf   :  { %v163_v39 = vpop.permute.xlu1 %162 }
  0xc0   :  { %vm170_vm15 = vcmp.eq.s32.totalorder %v808_v14, %v163_v39  ;;  %vm171_vm7 = vcmp.eq.s32.totalorder %v811_v17, %v163_v39 }
  0xc1   :  { %vm178_vm2 = vmor %vm146_vm14, %vm170_vm15 }
  0xc2   :  { %vm179_vm8 = vmor %vm147_vm0, %vm171_vm7  ;;  %v469_v40 = vsel %vm178_vm2, 1.0, %v639_v23 }
  0xc3   :  { %v470_v41 = vsel %vm179_vm8, 1.0, %v639_v23 }
  0xc4   :  { %475 = vmatprep.mubr.msk.f32.mxu0 %vm931_vm10, %v470_v41 }
  0xc5   :  { %325 = vmatmul.mubr.f32.gmra.mrb[6].mxu0 %v469_v40 }
 0x16f   :  { %v510_v49 = vpop.f32.mrb[0].mxu0 }
 0x170   :  { %v511_v50 = vpop.f32.mrb[1].mxu0 }
 0x171   :  { %v512_v51 = vadd.f32 %v511_v50, %v510_v49 }
 0x173   :  { %v330_v60 = vmax.f32 %v512_v51, 0.0 }
 0x175   :  { %v346_v63 = vsel %vm345_vm1, %v330_v60, -inf }
 0x179   :  { %v513_v56 = vpop.f32.mrb[2].mxu0 }
 0x17a   :  { %v514_v58 = vpop.f32.mrb[3].mxu0 }
 0x17b   :  { %v515_v59 = vadd.f32 %v514_v58, %v513_v56 }
 0x17d   :  { %v331_v61 = vmax.f32 %v515_v59, 0.0 }
 0x17f   :  { %v344_v62 = vsel %vm342_vm12, %v331_v61, 0.0 }
 0x180   :  { %v347_v0 = vsel %vm345_vm1, %v344_v62, -inf }
 0x181   :  { %v348_v1 = vmax.f32 %v346_v63, %v347_v0 }
 0x183   :  { %v349_v6 = vrot.slane %v348_v1, 4 }
 0x185   :  { %v350_v10 = vmax.f32 %v348_v1, %v349_v6 }
 0x187   :  { %v351_v16 = vrot.slane %v350_v10, 2 }
 0x188   :  { %v516_v3 = vpop.f32.mrb[4].mxu0 }
 0x189   :  { %v517_v4 = vpop.f32.mrb[5].mxu0  ;;  %v352_v19 = vmax.f32 %v350_v10, %v351_v16 }
 0x18a   :  { %v518_v5 = vadd.f32 %v517_v4, %v516_v3 }
 0x18b   :  { %v353_v22 = vrot.slane %v352_v19, 1 }
 0x18c   :  { %v332_v9 = vmax.f32 %v518_v5, 0.0 }
 0x18d   :  { %v354_v24 = vmax.f32 %v352_v19, %v353_v22 }
 0x18e   :  { %v357_v13 = vsel %vm345_vm1, %v332_v9, -inf }
 0x198   :  { %v519_v7 = vpop.f32.mrb[6].mxu0 }
 0x199   :  { %v520_v8 = vpop.f32.mrb[7].mxu0 }
 0x19a   :  { %v521_v2 = vadd.f32 %v520_v8, %v519_v7 }
 0x19c   :  { %v333_v11 = vmax.f32 %v521_v2, 0.0 }
 0x19e   :  { %v356_v12 = vsel %vm342_vm12, %v333_v11, 0.0 }
 0x19f   :  { %v358_v14 = vsel %vm345_vm1, %v356_v12, -inf }
 0x1a0   :  { %v359_v17 = vmax.f32 %v357_v13, %v358_v14 }
 0x1a2   :  { %v360_v18 = vrot.slane %v359_v17, 4 }
 0x1a4   :  { %v361_v15 = vmax.f32 %v359_v17, %v360_v18 }
 0x1a6   :  { %v362_v20 = vrot.slane %v361_v15, 2 }
 0x1a8   :  { %v363_v21 = vmax.f32 %v361_v15, %v362_v20 }
 0x1aa   :  { %v364_v23 = vrot.slane %v363_v21, 1 }
 0x1ac   :  { %v365_v25 = vmax.f32 %v363_v21, %v364_v23 }
 0x1ae   :  { %v367_v26 = vsel %vm366_vm3, %v354_v24, %v365_v25 }
 0x1af   :  { %536 = vmatmul.mubr.msk.f32.vlgmr.msra.gmra.mrb[0].mxu1 %vm345_vm1, %v367_v26 }
 0x282   :  { %v444_v27 = vpop.f32.mrb[0].mxu1 }
 0x283   :  { %448 = vst [vmem:[#allocation2] sm:$0x3] %v444_v27  ;;  %v537_v28 = vpop.f32.mrb[1].mxu1 }
 0x284   :  { %620 = shalt.err (!%p617_p4)
}
 0x285   :  { %s621_s13 = scalar_lea.hbm %s921_s3, 32 }
 0x286   :  { %p622_p5 = scmp.ne.s32.totalorder %s921_s3, %s621_s13  ;;  %p625_p6 = scmp.lt.u32.totalorder %s621_s13, %s921_s3 }
 0x288   :  { %p627_p7 = pnand %p625_p6, %p622_p5 }
 0x28a   :  { %630 = shalt.err (!%p627_p7)
}
 0x28b   :  { %458 = dma.vmem_to_hbm [thread:$0]  %s456_s9, 32, %s921_s3, [#allocation3]  }
 0x28c   :  { %631 = dma.done.wait [#allocation3], 32  }
 0x28d   :  { %632 = vsyncadd [#allocation3], 4294967264 }
 0x28e   :  { %462 = vsyncpa [#allocation3], 1 }

</bundles_post_ra>
